<compile_context>
chip_gen: v7x
topology: tpu7x:2x2x1
jax: 0.10.0
libtpu: 0.0.40
codegen_flags: <defaults>
</compile_context>

<pallas_src>
import jax
import jax.numpy as jnp
from jax.experimental import pallas as pl
from jax.experimental.pallas import tpu as pltpu

LANE = 128      # TPU lane width (last dim)
SUBLANE = 8     # TPU sublane width (second-to-last dim)


def _pad_axis(a, axis, multiple):
    """Zero-pad `a` along `axis` up to the next multiple of `multiple`."""
    size = a.shape[axis]
    pad = (-size) % multiple
    if pad == 0:
        return a
    widths = [(0, 0)] * a.ndim
    widths[axis] = (0, pad)
    return jnp.pad(a, widths)


def make_mlp_kernel(num_used_hidden):
    """Fused MLP kernel; hidden-layer loop is statically unrolled.

    `num_used_hidden` = number of hidden layers actually applied
    (= num_hidden_layers - 1, since the PyTorch loop starts at index 1)."""

    def mlp_kernel(x_ref, wi_ref, bi_ref, wh_ref, bh_ref, wo_ref, bo_ref, out_ref):
        # Input layer + ReLU
        curr = jnp.dot(x_ref[...], wi_ref[...],
                       preferred_element_type=jnp.float32) + bi_ref[...]
        curr = jnp.maximum(curr, 0.0)

        # Hidden layers (layer 0 of the PyTorch Wh list is intentionally skipped
        # and was already sliced off in the wrapper, so index from 0 here).
        for i in range(num_used_hidden):
            curr = jnp.dot(curr, wh_ref[i],
                           preferred_element_type=jnp.float32) + bh_ref[i]
            # dropout(eval) = identity
            curr = jnp.maximum(curr, 0.0)

        # Output layer (no nonlinearity)
        out_ref[...] = (jnp.dot(curr, wo_ref[...],
                                preferred_element_type=jnp.float32)
                        + bo_ref[...]).astype(out_ref.dtype)

    return mlp_kernel


def make_mlp_kernel_no_hidden():
    """Variant for num_hidden_layers <= 1 (no Wh applied at all)."""

    def mlp_kernel(x_ref, wi_ref, bi_ref, wo_ref, bo_ref, out_ref):
        curr = jnp.dot(x_ref[...], wi_ref[...],
                       preferred_element_type=jnp.float32) + bi_ref[...]
        curr = jnp.maximum(curr, 0.0)
        out_ref[...] = (jnp.dot(curr, wo_ref[...],
                                preferred_element_type=jnp.float32)
                        + bo_ref[...]).astype(out_ref.dtype)

    return mlp_kernel


def neural_network_forward(x, params, num_hidden_layers):
    """x: (batch, output_dim) float32. Returns (batch, output_dim) float32."""
    wi, bi, wh, bh, wo, bo = params
    batch, in_dim = x.shape
    out_dim = wo.shape[1]

    # Drop the never-used Wh[0]/bh[0] BEFORE the pallas_call so they are never
    # DMA'd into VMEM.
    num_used = max(num_hidden_layers - 1, 0)
    wh_used = wh[1:1 + num_used]
    bh_used = bh[1:1 + num_used]

    # Zero-pad to lane-dense / sublane-aligned shapes (exact: padded terms are 0).
    x_p = _pad_axis(_pad_axis(x, 1, LANE), 0, SUBLANE)
    wi_p = _pad_axis(_pad_axis(wi, 0, LANE), 1, LANE)
    bi_p = _pad_axis(bi, 1, LANE)
    wo_p = _pad_axis(_pad_axis(wo, 0, LANE), 1, LANE)
    bo_p = _pad_axis(bo, 1, LANE)

    batch_p = x_p.shape[0]
    out_dim_p = bo_p.shape[1]

    vmem_spec = pl.BlockSpec(memory_space=pltpu.VMEM)
    out_shape = jax.ShapeDtypeStruct((batch_p, out_dim_p), jnp.float32)
    compiler_params = pltpu.CompilerParams(vmem_limit_bytes=64 * 1024 * 1024)

    if num_used == 0:
        out_p = pl.pallas_call(
            make_mlp_kernel_no_hidden(),
            out_shape=out_shape,
            in_specs=[vmem_spec] * 5,
            out_specs=vmem_spec,
            compiler_params=compiler_params,
        )(x_p, wi_p, bi_p, wo_p, bo_p)
    else:
        wh_p = _pad_axis(_pad_axis(wh_used, 1, LANE), 2, LANE)
        bh_p = _pad_axis(bh_used, 2, LANE)
        out_p = pl.pallas_call(
            make_mlp_kernel(num_used),
            out_shape=out_shape,
            in_specs=[vmem_spec] * 7,
            out_specs=vmem_spec,
            compiler_params=compiler_params,
        )(x_p, wi_p, bi_p, wh_p, bh_p, wo_p, bo_p)

    return out_p[:batch, :out_dim]


def init_params(key, num_hidden_layers, hidden_size, output_dim):
    """Deterministic init mimicking nn.Linear (uniform +-1/sqrt(fan_in)).
    Weights stored transposed: (in_features, out_features)."""
    ks = jax.random.split(key, 6)

    def uinit(k, shape, fan_in):
        bound = 1.0 / jnp.sqrt(fan_in)
        return jax.random.uniform(k, shape, jnp.float32, -bound, bound)

    wi = uinit(ks[0], (output_dim, hidden_size), output_dim)   # Wi: out_dim -> hidden
    bi = uinit(ks[1], (1, hidden_size), output_dim)
    wh = uinit(ks[2], (num_hidden_layers, hidden_size, hidden_size), hidden_size)
    bh = uinit(ks[3], (num_hidden_layers, 1, hidden_size), hidden_size)
    wo = uinit(ks[4], (hidden_size, output_dim), hidden_size)  # Wo: hidden -> out_dim
    bo = uinit(ks[5], (1, output_dim), hidden_size)
    return wi, bi, wh, bh, wo, bo


def reference_forward(x, params, num_hidden_layers):
    """Pure-JAX reference matching the PyTorch forward (eval mode)."""
    wi, bi, wh, bh, wo, bo = params
    curr = jnp.maximum(x @ wi + bi, 0.0)
    for i in range(1, num_hidden_layers):
        curr = jnp.maximum(curr @ wh[i] + bh[i], 0.0)
    return curr @ wo + bo


if __name__ == "__main__":
    # Module hyperparameters (small, consistent with the forward pass)
    num_hidden_layers = 3
    hidden_size = 32
    output_dim = 32      # input feature dim == output_dim (Wi: output_dim -> hidden)
    keep_prob = 0.9      # unused at eval time
    batch = 8

    key = jax.random.PRNGKey(0)
    kx, kp = jax.random.split(key)

    x = jax.random.normal(kx, (batch, output_dim), jnp.float32)
    params = init_params(kp, num_hidden_layers, hidden_size, output_dim)

    out = neural_network_forward(x, params, num_hidden_layers)
    out = jax.block_until_ready(out)

    ref = reference_forward(x, params, num_hidden_layers)
    assert out.shape == (batch, output_dim)
    assert jnp.allclose(out, ref, atol=1e-5, rtol=1e-5), "mismatch vs reference"

    print("KERNEL_OK")
</pallas_src>

<mosaic_0001>
module attributes {stable_mosaic.version = 11 : i64} {
  func.func @mlp_kernel(%arg0: memref<8x128xf32, #tpu.memory_space<vmem>>, %arg1: memref<128x128xf32, #tpu.memory_space<vmem>>, %arg2: memref<1x128xf32, #tpu.memory_space<vmem>>, %arg3: memref<2x128x128xf32, #tpu.memory_space<vmem>>, %arg4: memref<2x1x128xf32, #tpu.memory_space<vmem>>, %arg5: memref<128x128xf32, #tpu.memory_space<vmem>>, %arg6: memref<1x128xf32, #tpu.memory_space<vmem>>, %arg7: memref<8x128xf32, #tpu.memory_space<vmem>>) attributes {dimension_semantics = [], scalar_prefetch = 0 : i64, scratch_operands = 0 : i64, tpu.core_type = #tpu.core_type<tc>} {
    %c0 = arith.constant 0 : index
    %c0_0 = arith.constant 0 : index
    %0 = vector.load %arg0[%c0, %c0_0] : memref<8x128xf32, #tpu.memory_space<vmem>>, vector<8x128xf32>
    %c0_1 = arith.constant 0 : index
    %c0_2 = arith.constant 0 : index
    %1 = vector.load %arg1[%c0_1, %c0_2] : memref<128x128xf32, #tpu.memory_space<vmem>>, vector<128x128xf32>
    %cst = arith.constant dense<0.000000e+00> : vector<8x128xf32>
    %2 = tpu.matmul %0, %1, %cst {dimension_numbers = #tpu.dot_dimension_numbers<[1], [0], [0], [1], [0, 0, 1, 1], [], []>} : vector<8x128xf32>, vector<128x128xf32>, vector<8x128xf32> -> vector<8x128xf32>
    %c0_3 = arith.constant 0 : index
    %c0_4 = arith.constant 0 : index
    %3 = vector.load %arg2[%c0_3, %c0_4] : memref<1x128xf32, #tpu.memory_space<vmem>>, vector<1x128xf32>
    %4 = vector.broadcast %3 : vector<1x128xf32> to vector<8x128xf32>
    %5 = arith.addf %2, %4 : vector<8x128xf32>
    %cst_5 = arith.constant 0.000000e+00 : f32
    %6 = vector.broadcast %cst_5 : f32 to vector<8x128xf32>
    %7 = arith.maximumf %5, %6 : vector<8x128xf32>
    %c0_6 = arith.constant 0 : index
    %c0_7 = arith.constant 0 : index
    %c0_8 = arith.constant 0 : index
    %8 = vector.load %arg3[%c0_6, %c0_7, %c0_8] : memref<2x128x128xf32, #tpu.memory_space<vmem>>, vector<1x128x128xf32>
    %9 = vector.shape_cast %8 : vector<1x128x128xf32> to vector<128x128xf32>
    %cst_9 = arith.constant dense<0.000000e+00> : vector<8x128xf32>
    %10 = tpu.matmul %7, %9, %cst_9 {dimension_numbers = #tpu.dot_dimension_numbers<[1], [0], [0], [1], [0, 0, 1, 1], [], []>} : vector<8x128xf32>, vector<128x128xf32>, vector<8x128xf32> -> vector<8x128xf32>
    %c0_10 = arith.constant 0 : index
    %c0_11 = arith.constant 0 : index
    %c0_12 = arith.constant 0 : index
    %11 = vector.load %arg4[%c0_10, %c0_11, %c0_12] : memref<2x1x128xf32, #tpu.memory_space<vmem>>, vector<1x1x128xf32>
    %12 = vector.shape_cast %11 : vector<1x1x128xf32> to vector<1x128xf32>
    %13 = vector.broadcast %12 : vector<1x128xf32> to vector<8x128xf32>
    %14 = arith.addf %10, %13 : vector<8x128xf32>
    %cst_13 = arith.constant 0.000000e+00 : f32
    %15 = vector.broadcast %cst_13 : f32 to vector<8x128xf32>
    %16 = arith.maximumf %14, %15 : vector<8x128xf32>
    %c1 = arith.constant 1 : index
    %c0_14 = arith.constant 0 : index
    %c0_15 = arith.constant 0 : index
    %17 = vector.load %arg3[%c1, %c0_14, %c0_15] : memref<2x128x128xf32, #tpu.memory_space<vmem>>, vector<1x128x128xf32>
    %18 = vector.shape_cast %17 : vector<1x128x128xf32> to vector<128x128xf32>
    %cst_16 = arith.constant dense<0.000000e+00> : vector<8x128xf32>
    %19 = tpu.matmul %16, %18, %cst_16 {dimension_numbers = #tpu.dot_dimension_numbers<[1], [0], [0], [1], [0, 0, 1, 1], [], []>} : vector<8x128xf32>, vector<128x128xf32>, vector<8x128xf32> -> vector<8x128xf32>
    %c1_17 = arith.constant 1 : index
    %c0_18 = arith.constant 0 : index
    %c0_19 = arith.constant 0 : index
    %20 = vector.load %arg4[%c1_17, %c0_18, %c0_19] : memref<2x1x128xf32, #tpu.memory_space<vmem>>, vector<1x1x128xf32>
    %21 = vector.shape_cast %20 : vector<1x1x128xf32> to vector<1x128xf32>
    %22 = vector.broadcast %21 : vector<1x128xf32> to vector<8x128xf32>
    %23 = arith.addf %19, %22 : vector<8x128xf32>
    %cst_20 = arith.constant 0.000000e+00 : f32
    %24 = vector.broadcast %cst_20 : f32 to vector<8x128xf32>
    %25 = arith.maximumf %23, %24 : vector<8x128xf32>
    %c0_21 = arith.constant 0 : index
    %c0_22 = arith.constant 0 : index
    %26 = vector.load %arg5[%c0_21, %c0_22] : memref<128x128xf32, #tpu.memory_space<vmem>>, vector<128x128xf32>
    %cst_23 = arith.constant dense<0.000000e+00> : vector<8x128xf32>
    %27 = tpu.matmul %25, %26, %cst_23 {dimension_numbers = #tpu.dot_dimension_numbers<[1], [0], [0], [1], [0, 0, 1, 1], [], []>} : vector<8x128xf32>, vector<128x128xf32>, vector<8x128xf32> -> vector<8x128xf32>
    %c0_24 = arith.constant 0 : index
    %c0_25 = arith.constant 0 : index
    %28 = vector.load %arg6[%c0_24, %c0_25] : memref<1x128xf32, #tpu.memory_space<vmem>>, vector<1x128xf32>
    %29 = vector.broadcast %28 : vector<1x128xf32> to vector<8x128xf32>
    %30 = arith.addf %27, %29 : vector<8x128xf32>
    %c0_26 = arith.constant 0 : index
    %c0_27 = arith.constant 0 : index
    %31 = vector.load %arg7[%c0_26, %c0_27] : memref<8x128xf32, #tpu.memory_space<vmem>>, vector<8x128xf32>
    tpu.vector_store %arg7[%c0_26, %c0_27], %30 {strides = array<i32>} : memref<8x128xf32, #tpu.memory_space<vmem>>, vector<8x128xf32>,
    return
  }
}

</mosaic_0001>

<bundles_post_ra>
// kernel: tpu_custom_call.1
= control target key start
LH: loop header
LB: loop body
LE: loop exit
PB: predicated region body
PF: predicated region fallthrough
CT: control target
= control target key end

     0   :  { %12 = vsyncpa [#allocation3], 0  ;;  %s1222_s0 = inlined_call_operand.hbm [shape: f32[8,128], index: 0, kind: input, shape index: {}]   ;;  %s1223_s1 = inlined_call_operand.hbm [shape: f32[128,128], index: 1, kind: input, shape index: {}]   ;;  %s1224_s2 = inlined_call_operand.hbm [shape: f32[1,128], index: 2, kind: input, shape index: {}]   ;;  %s1225_s3 = inlined_call_operand.hbm [shape: f32[2,128,128], index: 3, kind: input, shape index: {}]   ;;  %s1226_s4 = inlined_call_operand.hbm [shape: f32[2,1,128], index: 4, kind: input, shape index: {}]   ;;  %s1227_s5 = inlined_call_operand.hbm [shape: f32[128,128], index: 5, kind: input, shape index: {}]   ;;  %s1228_s6 = inlined_call_operand.hbm [shape: f32[1,128], index: 6, kind: input, shape index: {}]   ;;  %s1229_s7 = inlined_call_operand.hbm [shape: f32[8,128], index: 7, kind: output, shape index: {}]  }
   0x1   :  { %13 = vsyncpa [#allocation6], 0 }
   0x2   :  { %14 = vsyncpa [#allocation9], 0 }
   0x3   :  { %15 = vsyncpa [#allocation12], 0 }
   0x4   :  { %16 = vsyncpa [#allocation4], 0  ;;  %s1022_s24 = smov [#allocation5]   ;;  %s836_s28 = scalar_lea.hbm %s1223_s1, 2048 }
   0x5   :  { %s32_s25 = sshll.u32 %s1022_s24, 4  ;;  %p837_p0 = scmp.ne.s32.totalorder %s1223_s1, %s836_s28  ;;  %s33_s25 = int_to_ptr.vmem [resolvable:$true] %s32_s25 }
   0x6   :  { %p840_p1 = scmp.lt.u32.totalorder %s836_s28, %s1223_s1 }
   0x8   :  { %p842_p2 = pnand %p840_p1, %p837_p0 }
   0xa   :  { %845 = shalt.err (!%p842_p2)
}
   0xb   :  { %s846_s10 = scalar_lea.vmem %s33_s25, 2048  ;;  %p851_p4 = scmp.lt.s32.totalorder %s33_s25, %s33_s25 }
   0xc   :  { %p847_p3 = scmp.ne.s32.totalorder %s33_s25, %s846_s10  ;;  %p852_p5 = scmp.lt.s32.totalorder %s846_s10, %s846_s10 }
   0xe   :  { %p853_p6 = por %p852_p5, %p851_p4 }
  0x10   :  { %p854_p7 = pnand %p853_p6, %p847_p3 }
  0x12   :  { %857 = shalt.err (!%p854_p7)
}
  0x13   :  { %s1023_s11 = smov 128   ;;  %s1024_s12 = smov 8  }
  0x14   :  { %38 = dma.hbm_to_vmem [thread:$0]  %s1223_s1, 2048, %s33_s25, [#allocation6], %s1023_s11, %s1023_s11, %s1024_s12  }
  0x15   :  { %s1025_s15 = smov [#allocation8]   ;;  %s1026_s17 = smov [#allocation11]  }
  0x16   :  { %s54_s16 = sshll.u32 %s1025_s15, 4  ;;  %s78_s18 = sshll.u32 %s1026_s17, 4  ;;  %s55_s16 = int_to_ptr.vmem [resolvable:$true] %s54_s16  ;;  %s79_s18 = int_to_ptr.vmem [resolvable:$true] %s78_s18 }
  0x17   :  { %s858_s21 = scalar_lea.hbm %s1225_s3, 4096 }
  0x18   :  { %p859_p8 = scmp.ne.s32.totalorder %s1225_s3, %s858_s21  ;;  %p862_p9 = scmp.lt.u32.totalorder %s858_s21, %s1225_s3 }
  0x1a   :  { %p864_p10 = pnand %p862_p9, %p859_p8 }
  0x1c   :  { %867 = shalt.err (!%p864_p10)
}
  0x1d   :  { %s868_s1 = scalar_lea.vmem %s55_s16, 4096  ;;  %p873_p12 = scmp.lt.s32.totalorder %s55_s16, %s55_s16 }
  0x1e   :  { %p869_p11 = scmp.ne.s32.totalorder %s55_s16, %s868_s1  ;;  %p874_p13 = scmp.lt.s32.totalorder %s868_s1, %s868_s1 }
  0x20   :  { %p875_p0 = por %p874_p13, %p873_p12 }
  0x22   :  { %p876_p1 = pnand %p875_p0, %p869_p11 }
  0x24   :  { %879 = shalt.err (!%p876_p1)
}
  0x25   :  { %60 = dma.hbm_to_vmem [thread:$0]  %s1225_s3, 4096, %s55_s16, [#allocation9], %s1023_s11, %s1023_s11, %s1024_s12  }
  0x26   :  { %s880_s30 = scalar_lea.hbm %s1227_s5, 2048 }
  0x27   :  { %p881_p2 = scmp.ne.s32.totalorder %s1227_s5, %s880_s30  ;;  %p884_p3 = scmp.lt.u32.totalorder %s880_s30, %s1227_s5 }
  0x29   :  { %p886_p4 = pnand %p884_p3, %p881_p2 }
  0x2b   :  { %889 = shalt.err (!%p886_p4)
}
  0x2c   :  { %s890_s14 = scalar_lea.vmem %s79_s18, 2048  ;;  %p895_p6 = scmp.lt.s32.totalorder %s79_s18, %s79_s18 }
  0x2d   :  { %p891_p5 = scmp.ne.s32.totalorder %s79_s18, %s890_s14  ;;  %p896_p7 = scmp.lt.s32.totalorder %s890_s14, %s890_s14 }
  0x2f   :  { %p897_p8 = por %p896_p7, %p895_p6 }
  0x31   :  { %p898_p9 = pnand %p897_p8, %p891_p5 }
  0x33   :  { %901 = shalt.err (!%p898_p9)
}
  0x34   :  { %84 = dma.hbm_to_vmem [thread:$0]  %s1227_s5, 2048, %s79_s18, [#allocation12], %s1023_s11, %s1023_s11, %s1024_s12  }
  0x35   :  { %s1027_s16 = smov [#allocation2]   ;;  %s1028_s19 = smov [#allocation7]  }
  0x36   :  { %s23_s17 = sshll.u32 %s1027_s16, 4  ;;  %s45_s20 = sshll.u32 %s1028_s19, 4  ;;  %s24_s17 = int_to_ptr.vmem [resolvable:$true] %s23_s17  ;;  %s46_s20 = int_to_ptr.vmem [resolvable:$true] %s45_s20 }
  0x37   :  { %s902_s23 = scalar_lea.hbm %s1222_s0, 128 }
  0x38   :  { %p903_p10 = scmp.ne.s32.totalorder %s1222_s0, %s902_s23  ;;  %p906_p11 = scmp.lt.u32.totalorder %s902_s23, %s1222_s0 }
  0x3a   :  { %p908_p12 = pnand %p906_p11, %p903_p10 }
  0x3c   :  { %911 = shalt.err (!%p908_p12)
}
  0x3d   :  { %s912_s5 = scalar_lea.vmem %s24_s17, 128  ;;  %p917_p0 = scmp.lt.s32.totalorder %s24_s17, %s24_s17 }
  0x3e   :  { %p913_p13 = scmp.ne.s32.totalorder %s24_s17, %s912_s5  ;;  %p918_p1 = scmp.lt.s32.totalorder %s912_s5, %s912_s5 }
  0x40   :  { %p919_p2 = por %p918_p1, %p917_p0 }
  0x42   :  { %p920_p3 = pnand %p919_p2, %p913_p13 }
  0x44   :  { %923 = shalt.err (!%p920_p3)
}
  0x45   :  { %26 = dma.hbm_to_vmem [thread:$0]  %s1222_s0, 128, %s24_s17, [#allocation3]  }
  0x46   :  { %s924_s28 = scalar_lea.hbm %s1224_s2, 16 }
  0x47   :  { %p925_p4 = scmp.ne.s32.totalorder %s1224_s2, %s924_s28  ;;  %p928_p5 = scmp.lt.u32.totalorder %s924_s28, %s1224_s2 }
  0x49   :  { %p930_p6 = pnand %p928_p5, %p925_p4 }
  0x4b   :  { %933 = shalt.err (!%p930_p6)
}
  0x4c   :  { %s934_s10 = scalar_lea.vmem %s46_s20, 16  ;;  %s938_s13 = scalar_lea.vmem %s46_s20, 32 }
  0x4d   :  { %p935_p7 = scmp.ne.s32.totalorder %s46_s20, %s934_s10  ;;  %p939_p8 = scmp.lt.s32.totalorder %s46_s20, %s46_s20 }
  0x4e   :  { %p940_p9 = scmp.lt.s32.totalorder %s938_s13, %s934_s10 }
  0x50   :  { %p941_p10 = por %p940_p9, %p939_p8 }
  0x52   :  { %p942_p11 = pnand %p941_p10, %p935_p7 }
  0x54   :  { %945 = shalt.err (!%p942_p11)
}
  0x55   :  { %48 = dma.hbm_to_vmem [thread:$0]  %s1224_s2, 16, %s46_s20, [#allocation6]  }
  0x56   :  { %s1029_s3 = smov [#allocation10]   ;;  %s946_s19 = scalar_lea.hbm %s1226_s4, 32 }
  0x57   :  { %s66_s15 = sshll.u32 %s1029_s3, 4  ;;  %p947_p12 = scmp.ne.s32.totalorder %s1226_s4, %s946_s19  ;;  %s67_s15 = int_to_ptr.vmem [resolvable:$true] %s66_s15 }
  0x58   :  { %p950_p13 = scmp.lt.u32.totalorder %s946_s19, %s1226_s4 }
  0x5a   :  { %p952_p0 = pnand %p950_p13, %p947_p12 }
  0x5c   :  { %955 = shalt.err (!%p952_p0)
}
  0x5d   :  { %s956_s26 = scalar_lea.vmem %s67_s15, 32  ;;  %p961_p2 = scmp.lt.s32.totalorder %s67_s15, %s67_s15 }
  0x5e   :  { %p957_p1 = scmp.ne.s32.totalorder %s67_s15, %s956_s26  ;;  %p962_p3 = scmp.lt.s32.totalorder %s956_s26, %s956_s26 }
  0x60   :  { %p963_p4 = por %p962_p3, %p961_p2 }
  0x62   :  { %p964_p5 = pnand %p963_p4, %p957_p1 }
  0x64   :  { %967 = shalt.err (!%p964_p5)
}
  0x65   :  { %s1030_s2 = smov 16   ;;  %s1031_s20 = smov 1  }
  0x66   :  { %72 = dma.hbm_to_vmem [thread:$0]  %s1226_s4, 32, %s67_s15, [#allocation9], %s1030_s2, %s1030_s2, %s1031_s20  }
  0x67   :  { %s1032_s5 = smov [#allocation13]   ;;  %s968_s27 = scalar_lea.hbm %s1228_s6, 16 }
  0x68   :  { %s91_s11 = sshll.u32 %s1032_s5, 4  ;;  %p969_p6 = scmp.ne.s32.totalorder %s1228_s6, %s968_s27  ;;  %s92_s11 = int_to_ptr.vmem [resolvable:$true] %s91_s11 }
  0x69   :  { %p972_p7 = scmp.lt.u32.totalorder %s968_s27, %s1228_s6 }
  0x6b   :  { %p974_p8 = pnand %p972_p7, %p969_p6 }
  0x6d   :  { %977 = shalt.err (!%p974_p8)
}
  0x6e   :  { %s978_s9 = scalar_lea.vmem %s92_s11, 16  ;;  %s982_s4 = scalar_lea.vmem %s92_s11, 32 }
  0x6f   :  { %p979_p9 = scmp.ne.s32.totalorder %s92_s11, %s978_s9  ;;  %p983_p10 = scmp.lt.s32.totalorder %s92_s11, %s92_s11 }
  0x70   :  { %p984_p11 = scmp.lt.s32.totalorder %s982_s4, %s978_s9 }
  0x72   :  { %p985_p12 = por %p984_p11, %p983_p10 }
  0x74   :  { %p986_p13 = pnand %p985_p12, %p979_p9 }
  0x76   :  { %989 = shalt.err (!%p986_p13)
}
  0x77   :  { %94 = dma.hbm_to_vmem [thread:$0]  %s1228_s6, 16, %s92_s11, [#allocation12]  }
  0x78   :  { %1012 = dma.done.wait [#allocation3], 128  }
  0x79   :  { %1013 = vsyncadd [#allocation3], 4294967168 }
  0x7a   :  { %1014 = dma.done.wait [#allocation6], 2064  }
  0x7b   :  { %1015 = vsyncadd [#allocation6], 4294965232 }
  0x7c   :  { %1016 = dma.done.wait [#allocation9], 4128  }
  0x7d   :  { %1017 = vsyncadd [#allocation9], 4294963168 }
  0x7e   :  { %1018 = dma.done.wait [#allocation12], 2064  }
  0x7f   :  { %1019 = vsyncadd [#allocation12], 4294965232  ;;  %v1033_v0 = vmov 0.0|0.0   ;;  %vm1034_vm0 = vmmov 0   ;;  %v1035_v1 = vmov 0.0   ;;  %v117_v2 = vld [vmem:[#allocation5] sm:$0xff] }
  0x80   :  { %725 = vmatprep.subr.bf16.mxu0 %v1033_v0  ;;  %617 = vmatprep.mubr.msk.f32.mxu0 %vm1034_vm0, %v1035_v1  ;;  %v118_v3 = vld [vmem:[#allocation5 + $0x8] sm:$0xff]  ;;  %v119_v4 = vld [vmem:[#allocation5 + $0x10] sm:$0xff]  ;;  %v120_v6 = vld [vmem:[#allocation5 + $0x18] sm:$0xff]  ;;  %s1036_s6 = smov [#allocation14]  }
  0x81   :  { %749 = vmatprep.subr.bf16.mxu1 %v1033_v0  ;;  %652 = vmatprep.mubr.msk.f32.mxu1 %vm1034_vm0, %v1035_v1  ;;  %v726_v5 = vpack.c.bf16 %v118_v3, %v117_v2  ;;  %v729_v7 = vpack.c.bf16 %v120_v6, %v119_v4  ;;  %v121_v8 = vld [vmem:[#allocation5 + $0x20] sm:$0xff]  ;;  %v122_v9 = vld [vmem:[#allocation5 + $0x28] sm:$0xff]  ;;  %v213_v12 = vld [vmem:[#allocation8 + $0x10] sm:$0xff]  ;;  %s501_s0 = sshll.u32 %s1036_s6, 4  ;;  %s502_s0 = int_to_ptr.vmem [resolvable:$true] %s501_s0 }
  0x82   :  { %v211_v10 = vld [vmem:[#allocation8] sm:$0xff]  ;;  %v212_v11 = vld [vmem:[#allocation8 + $0x8] sm:$0xff]  ;;  %v214_v13 = vld [vmem:[#allocation8 + $0x18] sm:$0xff]  ;;  %v732_v14 = vpack.c.bf16 %v122_v9, %v121_v8  ;;  %s990_s14 = scalar_lea.vmem %s502_s0, 128  ;;  %p995_p1 = scmp.lt.s32.totalorder %s502_s0, %s502_s0 }
  0x83   :  { %727 = vmatpush3.bf16.msra.mxu0 %v726_v5  ;;  %v750_v15 = vpack.c.bf16 %v212_v11, %v211_v10  ;;  %v123_v16 = vld [vmem:[#allocation5 + $0x30] sm:$0xff]  ;;  %v124_v17 = vld [vmem:[#allocation5 + $0x38] sm:$0xff]  ;;  %v753_v18 = vpack.c.bf16 %v214_v13, %v213_v12  ;;  %v215_v19 = vld [vmem:[#allocation8 + $0x20] sm:$0xff]  ;;  %p991_p0 = scmp.ne.s32.totalorder %s502_s0, %s990_s14  ;;  %p996_p2 = scmp.lt.s32.totalorder %s990_s14, %s990_s14 }
  0x84   :  { %728 = vmatprep.subr.bf16.mxu0 %v1033_v0  ;;  %v216_v20 = vld [vmem:[#allocation8 + $0x28] sm:$0xff]  ;;  %v735_v21 = vpack.c.bf16 %v124_v17, %v123_v16  ;;  %v125_v22 = vld [vmem:[#allocation5 + $0x40] sm:$0xff]  ;;  %v217_v25 = vld [vmem:[#allocation8 + $0x30] sm:$0xff] }
  0x85   :  { %751 = vmatpush3.bf16.msra.mxu1 %v750_v15  ;;  %v126_v23 = vld [vmem:[#allocation5 + $0x48] sm:$0xff]  ;;  %v756_v24 = vpack.c.bf16 %v216_v20, %v215_v19  ;;  %v218_v26 = vld [vmem:[#allocation8 + $0x38] sm:$0xff]  ;;  %v127_v28 = vld [vmem:[#allocation5 + $0x50] sm:$0xff]  ;;  %p997_p3 = por %p996_p2, %p995_p1 }
  0x86   :  { %752 = vmatprep.subr.bf16.mxu1 %v1033_v0  ;;  %v738_v27 = vpack.c.bf16 %v126_v23, %v125_v22  ;;  %v128_v29 = vld [vmem:[#allocation5 + $0x58] sm:$0xff]  ;;  %v759_v30 = vpack.c.bf16 %v218_v26, %v217_v25  ;;  %v219_v31 = vld [vmem:[#allocation8 + $0x40] sm:$0xff]  ;;  %v220_v32 = vld [vmem:[#allocation8 + $0x48] sm:$0xff] }
  0x87   :  { %730 = vmatpush3.bf16.msra.mxu0 %v729_v7  ;;  %v741_v33 = vpack.c.bf16 %v128_v29, %v127_v28  ;;  %v129_v34 = vld [vmem:[#allocation5 + $0x60] sm:$0xff]  ;;  %v130_v35 = vld [vmem:[#allocation5 + $0x68] sm:$0xff]  ;;  %v762_v36 = vpack.c.bf16 %v220_v32, %v219_v31  ;;  %v221_v37 = vld [vmem:[#allocation8 + $0x50] sm:$0xff]  ;;  %p998_p4 = pnand %p997_p3, %p991_p0 }
  0x88   :  { %731 = vmatprep.subr.bf16.mxu0 %v1033_v0  ;;  %v222_v38 = vld [vmem:[#allocation8 + $0x58] sm:$0xff]  ;;  %v744_v39 = vpack.c.bf16 %v130_v35, %v129_v34  ;;  %v131_v40 = vld [vmem:[#allocation5 + $0x70] sm:$0xff]  ;;  %v223_v43 = vld [vmem:[#allocation8 + $0x60] sm:$0xff] }
  0x89   :  { %754 = vmatpush3.bf16.msra.mxu1 %v753_v18  ;;  %v132_v41 = vld [vmem:[#allocation5 + $0x78] sm:$0xff]  ;;  %v765_v42 = vpack.c.bf16 %v222_v38, %v221_v37  ;;  %v224_v44 = vld [vmem:[#allocation8 + $0x68] sm:$0xff]  ;;  %v306_v51 = vld [vmem:[#allocation8 + $0x80] sm:$0xff] }
  0x8a   :  { %755 = vmatprep.subr.bf16.mxu1 %v1033_v0  ;;  %v747_v45 = vpack.c.bf16 %v132_v41, %v131_v40  ;;  %v768_v46 = vpack.c.bf16 %v224_v44, %v223_v43  ;;  %v116_v47 = vld [vmem:[#allocation2] sm:$0xff]  ;;  %v307_v52 = vld [vmem:[#allocation8 + $0x88] sm:$0xff]  ;;  %v310_v57 = vld [vmem:[#allocation8 + $0xa0] sm:$0xff] }
  0x8b   :  { %733 = vmatpush3.bf16.msra.mxu0 %v732_v14  ;;  %v225_v48 = vld [vmem:[#allocation8 + $0x70] sm:$0xff]  ;;  %v226_v49 = vld [vmem:[#allocation8 + $0x78] sm:$0xff]  ;;  %v774_v54 = vpack.c.bf16 %v307_v52, %v306_v51  ;;  %v311_v58 = vld [vmem:[#allocation8 + $0xa8] sm:$0xff] }
  0x8c   :  { %734 = vmatprep.subr.bf16.mxu0 %v1033_v0  ;;  %v771_v50 = vpack.c.bf16 %v226_v49, %v225_v48  ;;  %v308_v53 = vld [vmem:[#allocation8 + $0x90] sm:$0xff]  ;;  %v309_v55 = vld [vmem:[#allocation8 + $0x98] sm:$0xff]  ;;  %v780_v59 = vpack.c.bf16 %v311_v58, %v310_v57  ;;  %v314_v63 = vld [vmem:[#allocation8 + $0xc0] sm:$0xff] }
  0x8d   :  { %757 = vmatpush3.bf16.msra.mxu1 %v756_v24  ;;  %v777_v56 = vpack.c.bf16 %v309_v55, %v308_v53  ;;  %v312_v60 = vld [vmem:[#allocation8 + $0xb0] sm:$0xff]  ;;  %v313_v61 = vld [vmem:[#allocation8 + $0xb8] sm:$0xff]  ;;  %v315_v2 = vld [vmem:[#allocation8 + $0xc8] sm:$0xff] }
  0x8e   :  { %758 = vmatprep.subr.bf16.mxu1 %v1033_v0  ;;  %v783_v62 = vpack.c.bf16 %v313_v61, %v312_v60  ;;  %v786_v3 = vpack.c.bf16 %v315_v2, %v314_v63  ;;  %v316_v4 = vld [vmem:[#allocation8 + $0xd0] sm:$0xff]  ;;  %v317_v5 = vld [vmem:[#allocation8 + $0xd8] sm:$0xff]  ;;  %v318_v7 = vld [vmem:[#allocation8 + $0xe0] sm:$0xff] }
  0x8f   :  { %736 = vmatpush3.bf16.msra.mxu0 %v735_v21  ;;  %v789_v6 = vpack.c.bf16 %v317_v5, %v316_v4  ;;  %v319_v8 = vld [vmem:[#allocation8 + $0xe8] sm:$0xff]  ;;  %v513_v10 = vld [vmem:[#allocation7] ss:$0 sm:$0xff]  ;;  %v320_v15 = vld [vmem:[#allocation8 + $0xf0] sm:$0xff] }
  0x90   :  { %737 = vmatprep.subr.bf16.mxu0 %v1033_v0  ;;  %v792_v9 = vpack.c.bf16 %v319_v8, %v318_v7  ;;  %v321_v16 = vld [vmem:[#allocation8 + $0xf8] sm:$0xff]  ;;  %v401_v18 = vld [vmem:[#allocation11] sm:$0xff]  ;;  %v402_v19 = vld [vmem:[#allocation11 + $0x8] sm:$0xff] }
  0x91   :  { %760 = vmatpush3.bf16.msra.mxu1 %v759_v30  ;;  %v795_v17 = vpack.c.bf16 %v321_v16, %v320_v15  ;;  %v403_v20 = vld [vmem:[#allocation11 + $0x10] sm:$0xff]  ;;  %v798_v21 = vpack.c.bf16 %v402_v19, %v401_v18  ;;  %v404_v22 = vld [vmem:[#allocation11 + $0x18] sm:$0xff]  ;;  %v405_v24 = vld [vmem:[#allocation11 + $0x20] sm:$0xff] }
  0x92   :  { %761 = vmatprep.subr.bf16.mxu1 %v1033_v0  ;;  %v801_v23 = vpack.c.bf16 %v404_v22, %v403_v20  ;;  %v406_v25 = vld [vmem:[#allocation11 + $0x28] sm:$0xff]  ;;  %v409_v29 = vld [vmem:[#allocation11 + $0x40] sm:$0xff]  ;;  %v411_v32 = vld [vmem:[#allocation11 + $0x50] sm:$0xff] }
  0x93   :  { %739 = vmatpush3.bf16.msra.mxu0 %v738_v27  ;;  %v804_v26 = vpack.c.bf16 %v406_v25, %v405_v24  ;;  %v408_v27 = vld [vmem:[#allocation11 + $0x38] sm:$0xff]  ;;  %v410_v30 = vld [vmem:[#allocation11 + $0x48] sm:$0xff]  ;;  %v413_v35 = vld [vmem:[#allocation11 + $0x60] sm:$0xff] }
  0x94   :  { %740 = vmatprep.subr.bf16.mxu0 %v1033_v0  ;;  %v810_v31 = vpack.c.bf16 %v410_v30, %v409_v29  ;;  %v514_v38 = vld [vmem:[#allocation10] ss:$0 sm:$0xff]  ;;  %v415_v43 = vld [vmem:[#allocation11 + $0x70] sm:$0xff]  ;;  %v516_v51 = vld [vmem:[#allocation13] ss:$0 sm:$0xff] }
  0x95   :  { %763 = vmatpush3.bf16.msra.mxu1 %v762_v36  ;;  %v414_v36 = vld [vmem:[#allocation11 + $0x68] sm:$0xff]  ;;  %v416_v44 = vld [vmem:[#allocation11 + $0x78] sm:$0xff] }
  0x96   :  { %764 = vmatprep.subr.bf16.mxu1 %v1033_v0  ;;  %v816_v37 = vpack.c.bf16 %v414_v36, %v413_v35 }
  0x97   :  { %742 = vmatpush3.bf16.msra.mxu0 %v741_v33  ;;  %v412_v33 = vld [vmem:[#allocation11 + $0x58] sm:$0xff] }
  0x98   :  { %743 = vmatprep.subr.bf16.mxu0 %v1033_v0  ;;  %v813_v34 = vpack.c.bf16 %v412_v33, %v411_v32 }
  0x99   :  { %766 = vmatpush3.bf16.msra.mxu1 %v765_v42 }
  0x9a   :  { %767 = vmatprep.subr.bf16.mxu1 %v1033_v0 }
  0x9b   :  { %745 = vmatpush3.bf16.msra.mxu0 %v744_v39 }
  0x9c   :  { %746 = vmatprep.subr.bf16.mxu0 %v1033_v0 }
  0x9d   :  { %769 = vmatpush3.bf16.msra.mxu1 %v768_v46  ;;  %v515_v46 = vld [vmem:[#allocation10 + $0x1] ss:$0 sm:$0xff] }
  0x9e   :  { %770 = vmatprep.subr.bf16.mxu1 %v1033_v0 }
  0x9f   :  { %748 = vmatpush3.bf16.msra.mxu0 %v747_v45  ;;  %v819_v45 = vpack.c.bf16 %v416_v44, %v415_v43 }
  0xa0   :  { %773 = vmatprep.subr.bf16.mxu0 %v1033_v0 }
  0xa1   :  { %772 = vmatpush3.bf16.msra.mxu1 %v771_v50 }
  0xa2   :  { %618 = vmatmul.mubr.f32.vlgmr.msra.gmra.mrb[0].mxu0 %v116_v47  ;;  %797 = vmatprep.subr.bf16.mxu1 %v1033_v0 }
  0xa3   :  { %687 = vmatprep.mubr.msk.f32.mxu0 %vm1034_vm0, %v1035_v1  ;;  %775 = vmatpush3.bf16.msra.mxu0 %v774_v54 }
  0xa4   :  { %776 = vmatprep.subr.bf16.mxu0 %v1033_v0 }
  0xa7   :  { %778 = vmatpush3.bf16.msra.mxu0 %v777_v56 }
  0xa8   :  { %779 = vmatprep.subr.bf16.mxu0 %v1033_v0 }
  0xab   :  { %781 = vmatpush3.bf16.msra.mxu0 %v780_v59 }
  0xac   :  { %782 = vmatprep.subr.bf16.mxu0 %v1033_v0 }
  0xaf   :  { %784 = vmatpush3.bf16.msra.mxu0 %v783_v62 }
  0xb0   :  { %785 = vmatprep.subr.bf16.mxu0 %v1033_v0 }
  0xb3   :  { %787 = vmatpush3.bf16.msra.mxu0 %v786_v3 }
  0xb4   :  { %788 = vmatprep.subr.bf16.mxu0 %v1033_v0 }
  0xb7   :  { %790 = vmatpush3.bf16.msra.mxu0 %v789_v6 }
  0xb8   :  { %791 = vmatprep.subr.bf16.mxu0 %v1033_v0 }
  0xbb   :  { %793 = vmatpush3.bf16.msra.mxu0 %v792_v9 }
  0xbc   :  { %794 = vmatprep.subr.bf16.mxu0 %v1033_v0 }
  0xbf   :  { %796 = vmatpush3.bf16.msra.mxu0 %v795_v17 }
 0x175   :  { %v206_v11 = vpop.f32.mrb[0].mxu0 }
 0x176   :  { %v207_v12 = vadd.f32 %v513_v10, %v206_v11  ;;  %v619_v13 = vpop.f32.mrb[1].mxu0 }
 0x178   :  { %v210_v14 = vmax.f32 %v207_v12, 0.0 }
 0x17a   :  { %653 = vmatmul.mubr.f32.vlgmr.msra.gmra.mrb[0].mxu1 %v210_v14 }
 0x17b   :  { %722 = vmatprep.mubr.msk.f32.mxu1 %vm1034_vm0, %v1035_v1  ;;  %799 = vmatpush3.bf16.msra.mxu1 %v798_v21  ;;  %v407_v1 = vld [vmem:[#allocation11 + $0x30] sm:$0xff] }
 0x17c   :  { %800 = vmatprep.subr.bf16.mxu1 %v1033_v0  ;;  %v807_v28 = vpack.c.bf16 %v408_v27, %v407_v1 }
 0x17f   :  { %802 = vmatpush3.bf16.msra.mxu1 %v801_v23 }
 0x180   :  { %803 = vmatprep.subr.bf16.mxu1 %v1033_v0 }
 0x183   :  { %805 = vmatpush3.bf16.msra.mxu1 %v804_v26 }
 0x184   :  { %806 = vmatprep.subr.bf16.mxu1 %v1033_v0 }
 0x187   :  { %808 = vmatpush3.bf16.msra.mxu1 %v807_v28 }
 0x188   :  { %809 = vmatprep.subr.bf16.mxu1 %v1033_v0 }
 0x18b   :  { %811 = vmatpush3.bf16.msra.mxu1 %v810_v31 }
 0x18c   :  { %812 = vmatprep.subr.bf16.mxu1 %v1033_v0 }
 0x18f   :  { %814 = vmatpush3.bf16.msra.mxu1 %v813_v34 }
 0x190   :  { %815 = vmatprep.subr.bf16.mxu1 %v1033_v0 }
 0x193   :  { %817 = vmatpush3.bf16.msra.mxu1 %v816_v37 }
 0x194   :  { %818 = vmatprep.subr.bf16.mxu1 %v1033_v0 }
 0x197   :  { %820 = vmatpush3.bf16.msra.mxu1 %v819_v45 }
 0x24d   :  { %v300_v39 = vpop.f32.mrb[0].mxu1 }
 0x24e   :  { %v301_v40 = vadd.f32 %v514_v38, %v300_v39  ;;  %v654_v41 = vpop.f32.mrb[1].mxu1 }
 0x250   :  { %v304_v42 = vmax.f32 %v301_v40, 0.0 }
 0x252   :  { %688 = vmatmul.mubr.f32.vlgmr.msra.gmra.mrb[2].mxu0 %v304_v42 }
 0x325   :  { %v396_v47 = vpop.f32.mrb[2].mxu0 }
 0x326   :  { %v397_v48 = vadd.f32 %v515_v46, %v396_v47  ;;  %v689_v49 = vpop.f32.mrb[3].mxu0 }
 0x328   :  { %v400_v50 = vmax.f32 %v397_v48, 0.0 }
 0x32a   :  { %723 = vmatmul.mubr.f32.vlgmr.msra.gmra.mrb[2].mxu1 %v400_v50 }
 0x3fd   :  { %v490_v0 = vpop.f32.mrb[2].mxu1 }
 0x3fe   :  { %v491_v52 = vadd.f32 %v516_v51, %v490_v0  ;;  %v724_v53 = vpop.f32.mrb[3].mxu1 }
 0x400   :  { %494 = vst [vmem:[#allocation14] sm:$0xff] %v491_v52 }
 0x401   :  { %1001 = shalt.err (!%p998_p4)
}
 0x402   :  { %s1002_s16 = scalar_lea.hbm %s1229_s7, 128 }
 0x403   :  { %p1003_p5 = scmp.ne.s32.totalorder %s1229_s7, %s1002_s16  ;;  %p1006_p6 = scmp.lt.u32.totalorder %s1002_s16, %s1229_s7 }
 0x405   :  { %p1008_p7 = pnand %p1006_p6, %p1003_p5 }
 0x407   :  { %1011 = shalt.err (!%p1008_p7)
}
 0x408   :  { %504 = dma.vmem_to_hbm [thread:$0]  %s502_s0, 128, %s1229_s7, [#allocation4]  }
 0x409   :  { %1020 = dma.done.wait [#allocation4], 128  }
 0x40a   :  { %1021 = vsyncadd [#allocation4], 4294967168 }
 0x40b   :  { %508 = vsyncpa [#allocation3], 1 }
 0x40c   :  { %509 = vsyncpa [#allocation6], 1 }
 0x40d   :  { %510 = vsyncpa [#allocation9], 1 }
 0x40e   :  { %511 = vsyncpa [#allocation12], 1 }
 0x40f   :  { %512 = vsyncpa [#allocation4], 1 }

</bundles_post_ra>
